<compile_context>
chip_gen: v7x
topology: tpu7x:2x2x1
jax: 0.10.0
libtpu: 0.0.40
codegen_flags: <defaults>
</compile_context>

<pallas_src>
import functools

import jax
import jax.numpy as jnp
from jax.experimental import pallas as pl
from jax.experimental.pallas import tpu as pltpu

SECONDS_PER_YEAR = 365.0 * 24.0 * 3600.0
HIDDEN = 64        # nn.Linear(1, 64)
HIDDEN_PAD = 128   # zero-padded to one full lane width / full MXU K
LANE = 128
SUBLANE = 8


def _round_up(x, m):
    return (x + m - 1) // m * m


@functools.lru_cache(maxsize=1)
def _vmem_capacity_bytes():
    try:
        return int(pltpu.get_tpu_info().vmem_capacity_bytes)
    except Exception:
        return 64 << 20  # conservative (v7x-sized) fallback


def _time_embed_kernel(t_ref, x_ref, w1_ref, b1_ref, w2_ref, b2_ref, o_ref):
    # t_ref: (TN, 1)                  x_ref / o_ref: (TN, D) in caller dtype
    # w1_ref / b1_ref: (1, 128) f32   w2_ref: (128, D)       b2_ref: (1, D) f32
    t = jnp.clip(t_ref[...].astype(jnp.float32) / SECONDS_PER_YEAR, 0.0, 1.0)

    # Linear(1 -> 128): K == 1, so a VPU broadcast multiply-add, not an MXU op.
    h = jnp.maximum(t * w1_ref[...] + b1_ref[...], 0.0)            # (TN, 128) f32

    # Linear(128 -> D): MXU matmul with f32 accumulation (w2 may be bf16).
    emb = jnp.dot(h.astype(w2_ref.dtype), w2_ref[...],
                  preferred_element_type=jnp.float32) + b2_ref[...]

    o_ref[...] = (x_ref[...].astype(jnp.float32) + emb).astype(o_ref.dtype)


def _choose_tile_n(n, d, x_itemsize, t_itemsize):
    """Rows per grid step (multiple of 8), sized against a per-chip VMEM budget."""
    if n <= SUBLANE:
        return max(int(n), 1)
    vmem_cap = _vmem_capacity_bytes()
    budget = (24 << 20) if vmem_cap >= (96 << 20) else (16 << 20)
    # Per-row VMEM cost of one grid step:
    per_row = 2 * d * x_itemsize               # x block, double-buffered
    per_row += 2 * d * x_itemsize              # out block, double-buffered
    per_row += 2 * LANE * max(t_itemsize, 4)   # t block lane-padded to 128 lanes, 2 bufs
    per_row += 4 * HIDDEN_PAD                  # f32 h temporary
    per_row += 2 * 4 * d                       # f32 upcast temporaries (x, emb)
    tile = budget // per_row
    cap = 4096 if d <= 512 else 1024                 # bigger tiles when D is small
    tc_split = _round_up(pl.cdiv(n, 4), SUBLANE)     # >= ~4 steps so v7x megacore splits
    tile = max(SUBLANE, min(tile, cap, tc_split))
    tile = (tile // SUBLANE) * SUBLANE
    return int(min(tile, _round_up(n, SUBLANE)))


@jax.jit
def simplified_time_embedding(x, time_diffs, w1, b1, w2, b2):
    """x: (B,S,D); time_diffs: (B,S); w1: (1,64); b1: (64,); w2: (64,D); b2: (D,)."""
    B, S, D = x.shape
    N = B * S

    # Free bitcasts only -- no padding / dtype change of the big tensors.
    x_flat = x.reshape(N, D)
    t_flat = time_diffs.reshape(N, 1)

    f32 = jnp.float32
    mxu_dtype = jnp.bfloat16 if D >= 1024 else f32   # bf16 operands keep v5e DMA-bound
    w1_p = jnp.pad(w1.astype(f32).reshape(1, HIDDEN), ((0, 0), (0, HIDDEN_PAD - HIDDEN)))
    b1_p = jnp.pad(b1.astype(f32).reshape(1, HIDDEN), ((0, 0), (0, HIDDEN_PAD - HIDDEN)))
    w2_p = jnp.pad(w2.astype(f32), ((0, HIDDEN_PAD - HIDDEN), (0, 0))).astype(mxu_dtype)
    b2_p = b2.astype(f32).reshape(1, D)

    x_bytes = x.dtype.itemsize
    t_bytes = time_diffs.dtype.itemsize
    tile_n = _choose_tile_n(N, D, x_bytes, t_bytes)
    grid = (pl.cdiv(N, tile_n),)

    # VMEM accounting: double-buffered streams, single-buffered weights, slack.
    tile_bytes = tile_n * (4 * D * x_bytes          # x + out, 2 buffers each
                           + 2 * LANE * 4           # lane-padded t, 2 buffers
                           + 4 * HIDDEN_PAD         # f32 h temp
                           + 2 * 4 * D)             # f32 upcast temporaries
    weight_bytes = (4 * 2 * HIDDEN_PAD
                    + jnp.dtype(mxu_dtype).itemsize * HIDDEN_PAD * D
                    + 4 * D)
    vmem_cap = _vmem_capacity_bytes()
    vmem_ceiling = (48 << 20) if vmem_cap >= (96 << 20) else (40 << 20)
    vmem_limit = int(min(vmem_ceiling,
                         max(32 << 20, tile_bytes + weight_bytes + (8 << 20))))

    flops = 2 * N * HIDDEN_PAD * D + 4 * N * HIDDEN_PAD + 2 * N * D
    bytes_accessed = 2 * N * D * x_bytes + N * t_bytes + int(weight_bytes)

    out_flat = pl.pallas_call(
        _time_embed_kernel,
        out_shape=jax.ShapeDtypeStruct((N, D), x.dtype),
        grid=grid,
        in_specs=[
            pl.BlockSpec((tile_n, 1), lambda i: (i, 0)),        # t   (streamed)
            pl.BlockSpec((tile_n, D), lambda i: (i, 0)),        # x   (streamed)
            pl.BlockSpec((1, HIDDEN_PAD), lambda i: (0, 0),     # w1  (resident)
                         pipeline_mode=pl.Buffered(1)),
            pl.BlockSpec((1, HIDDEN_PAD), lambda i: (0, 0),     # b1  (resident)
                         pipeline_mode=pl.Buffered(1)),
            pl.BlockSpec((HIDDEN_PAD, D), lambda i: (0, 0),     # w2  (resident)
                         pipeline_mode=pl.Buffered(1)),
            pl.BlockSpec((1, D), lambda i: (0, 0),              # b2  (resident)
                         pipeline_mode=pl.Buffered(1)),
        ],
        out_specs=pl.BlockSpec((tile_n, D), lambda i: (i, 0)),
        compiler_params=pltpu.CompilerParams(
            dimension_semantics=("parallel",),   # independent rows -> megacore split
            vmem_limit_bytes=vmem_limit,
        ),
        cost_estimate=pl.CostEstimate(
            flops=int(flops), transcendentals=0, bytes_accessed=int(bytes_accessed)),
    )(t_flat, x_flat, w1_p, b1_p, w2_p, b2_p)

    return out_flat.reshape(B, S, D)


def init_params(key, d_model):
    """Deterministic init mimicking nn.Linear default (uniform +/- 1/sqrt(fan_in))."""
    k1, k2, k3, k4 = jax.random.split(key, 4)
    bound1 = 1.0  # fan_in = 1
    w1 = jax.random.uniform(k1, (1, HIDDEN), jnp.float32, -bound1, bound1)
    b1 = jax.random.uniform(k2, (HIDDEN,), jnp.float32, -bound1, bound1)
    bound2 = 1.0 / (HIDDEN ** 0.5)
    w2 = jax.random.uniform(k3, (HIDDEN, d_model), jnp.float32, -bound2, bound2)
    b2 = jax.random.uniform(k4, (d_model,), jnp.float32, -bound2, bound2)
    return w1, b1, w2, b2


def reference(x, time_diffs, w1, b1, w2, b2):
    t = jnp.clip(time_diffs / SECONDS_PER_YEAR, 0.0, 1.0)[..., None]   # (B, S, 1)
    h = jnp.maximum(t @ w1 + b1, 0.0)                                  # (B, S, 64)
    emb = h @ w2 + b2                                                  # (B, S, D)
    return x + emb


if __name__ == "__main__":
    key = jax.random.PRNGKey(0)
    kx, kt, kp, kx2, kt2 = jax.random.split(key, 5)

    # Case 1: evenly tiled rows (B*S = 16 -> two 8-row grid steps).
    B, S, D = 2, 8, 32
    x = jax.random.normal(kx, (B, S, D), jnp.float32)
    time_diffs = jax.random.uniform(kt, (B, S), jnp.float32, 0.0, 2.0 * SECONDS_PER_YEAR)
    w1, b1, w2, b2 = init_params(kp, D)

    out = jax.block_until_ready(simplified_time_embedding(x, time_diffs, w1, b1, w2, b2))
    ref = reference(x, time_diffs, w1, b1, w2, b2)
    assert out.shape == (B, S, D) and out.dtype == x.dtype
    assert jnp.allclose(out, ref, atol=1e-5, rtol=1e-5), "mismatch vs reference (even tile)"

    # Case 2: ragged N (exercises the masked partial trailing block) + different D.
    B2, S2, D2 = 3, 7, 48
    x2 = jax.random.normal(kx2, (B2, S2, D2), jnp.float32)
    time_diffs2 = jax.random.uniform(kt2, (B2, S2), jnp.float32, 0.0, 2.0 * SECONDS_PER_YEAR)
    w1b, b1b, w2b, b2b = init_params(kp, D2)

    out2 = jax.block_until_ready(
        simplified_time_embedding(x2, time_diffs2, w1b, b1b, w2b, b2b))
    ref2 = reference(x2, time_diffs2, w1b, b1b, w2b, b2b)
    assert out2.shape == (B2, S2, D2)
    assert jnp.allclose(out2, ref2, atol=1e-5, rtol=1e-5), "mismatch vs reference (tail)"

    print("KERNEL_OK")
</pallas_src>

<mosaic_0001>
module attributes {stable_mosaic.version = 11 : i64} {
  func.func @_time_embed_kernel(%arg0: i32, %arg1: memref<8x1xf32, #tpu.memory_space<vmem>>, %arg2: memref<8x32xf32, #tpu.memory_space<vmem>>, %arg3: memref<1x128xf32, #tpu.memory_space<vmem>>, %arg4: memref<1x128xf32, #tpu.memory_space<vmem>>, %arg5: memref<128x32xf32, #tpu.memory_space<vmem>>, %arg6: memref<1x32xf32, #tpu.memory_space<vmem>>, %arg7: memref<8x32xf32, #tpu.memory_space<vmem>>) attributes {dimension_semantics = [#tpu.dimension_semantics<parallel>], iteration_bounds = array<i64: 2>, scalar_prefetch = 0 : i64, scratch_operands = 0 : i64, tpu.core_type = #tpu.core_type<tc>, window_params = [{transform_indices = @transform_0, window_bounds = array<i64: 8, 1>}, {transform_indices = @transform_1, window_bounds = array<i64: 8, 32>}, {pipeline_mode = #tpu.pipeline_mode<synchronous>, transform_indices = @transform_2, window_bounds = array<i64: 1, 128>}, {pipeline_mode = #tpu.pipeline_mode<synchronous>, transform_indices = @transform_3, window_bounds = array<i64: 1, 128>}, {pipeline_mode = #tpu.pipeline_mode<synchronous>, transform_indices = @transform_4, window_bounds = array<i64: 128, 32>}, {pipeline_mode = #tpu.pipeline_mode<synchronous>, transform_indices = @transform_5, window_bounds = array<i64: 1, 32>}, {transform_indices = @transform_6, window_bounds = array<i64: 8, 32>}]} {
    %c0 = arith.constant 0 : index
    %c0_0 = arith.constant 0 : index
    %0 = vector.load %arg1[%c0, %c0_0] : memref<8x1xf32, #tpu.memory_space<vmem>>, vector<8x1xf32>
    %cst = arith.constant 3.153600e+07 : f32
    %1 = vector.broadcast %cst : f32 to vector<8x1xf32>
    %2 = arith.divf %0, %1 : vector<8x1xf32>
    %cst_1 = arith.constant 0.000000e+00 : f32
    %cst_2 = arith.constant 1.000000e+00 : f32
    %3 = vector.broadcast %cst_1 : f32 to vector<8x1xf32>
    %4 = arith.maximumf %3, %2 : vector<8x1xf32>
    %5 = vector.broadcast %cst_2 : f32 to vector<8x1xf32>
    %6 = arith.minimumf %5, %4 : vector<8x1xf32>
    %c0_3 = arith.constant 0 : index
    %c0_4 = arith.constant 0 : index
    %7 = vector.load %arg3[%c0_3, %c0_4] : memref<1x128xf32, #tpu.memory_space<vmem>>, vector<1x128xf32>
    %8 = vector.broadcast %6 : vector<8x1xf32> to vector<8x128xf32>
    %9 = vector.broadcast %7 : vector<1x128xf32> to vector<8x128xf32>
    %10 = arith.mulf %8, %9 : vector<8x128xf32>
    %c0_5 = arith.constant 0 : index
    %c0_6 = arith.constant 0 : index
    %11 = vector.load %arg4[%c0_5, %c0_6] : memref<1x128xf32, #tpu.memory_space<vmem>>, vector<1x128xf32>
    %12 = vector.broadcast %11 : vector<1x128xf32> to vector<8x128xf32>
    %13 = arith.addf %10, %12 : vector<8x128xf32>
    %cst_7 = arith.constant 0.000000e+00 : f32
    %14 = vector.broadcast %cst_7 : f32 to vector<8x128xf32>
    %15 = arith.maximumf %13, %14 : vector<8x128xf32>
    %c0_8 = arith.constant 0 : index
    %c0_9 = arith.constant 0 : index
    %16 = vector.load %arg5[%c0_8, %c0_9] : memref<128x32xf32, #tpu.memory_space<vmem>>, vector<128x32xf32>
    %cst_10 = arith.constant dense<0.000000e+00> : vector<8x32xf32>
    %17 = tpu.matmul %15, %16, %cst_10 {dimension_numbers = #tpu.dot_dimension_numbers<[1], [0], [0], [1], [0, 0, 1, 1], [], []>} : vector<8x128xf32>, vector<128x32xf32>, vector<8x32xf32> -> vector<8x32xf32>
    %c0_11 = arith.constant 0 : index
    %c0_12 = arith.constant 0 : index
    %18 = vector.load %arg6[%c0_11, %c0_12] : memref<1x32xf32, #tpu.memory_space<vmem>>, vector<1x32xf32>
    %19 = vector.broadcast %18 : vector<1x32xf32> to vector<8x32xf32>
    %20 = arith.addf %17, %19 : vector<8x32xf32>
    %c0_13 = arith.constant 0 : index
    %c0_14 = arith.constant 0 : index
    %21 = vector.load %arg2[%c0_13, %c0_14] : memref<8x32xf32, #tpu.memory_space<vmem>>, vector<8x32xf32>
    %22 = arith.addf %21, %20 : vector<8x32xf32>
    %c0_15 = arith.constant 0 : index
    %c0_16 = arith.constant 0 : index
    %23 = vector.load %arg7[%c0_15, %c0_16] : memref<8x32xf32, #tpu.memory_space<vmem>>, vector<8x32xf32>
    tpu.vector_store %arg7[%c0_15, %c0_16], %22 {strides = array<i32>} : memref<8x32xf32, #tpu.memory_space<vmem>>, vector<8x32xf32>,
    return
  }
  func.func @transform_0(%arg0: i32) -> (i32, i32) {
    %c0_i32 = arith.constant 0 : i32
    %c0_i32_0 = arith.constant 0 : i32
    return %arg0, %c0_i32 : i32, i32
  }
  func.func @transform_1(%arg0: i32) -> (i32, i32) {
    %c0_i32 = arith.constant 0 : i32
    %c0_i32_0 = arith.constant 0 : i32
    return %arg0, %c0_i32 : i32, i32
  }
  func.func @transform_2(%arg0: i32) -> (i32, i32) {
    %c0_i32 = arith.constant 0 : i32
    %c0_i32_0 = arith.constant 0 : i32
    %c0_i32_1 = arith.constant 0 : i32
    return %c0_i32, %c0_i32_0 : i32, i32
  }
  func.func @transform_3(%arg0: i32) -> (i32, i32) {
    %c0_i32 = arith.constant 0 : i32
    %c0_i32_0 = arith.constant 0 : i32
    %c0_i32_1 = arith.constant 0 : i32
    return %c0_i32, %c0_i32_0 : i32, i32
  }
  func.func @transform_4(%arg0: i32) -> (i32, i32) {
    %c0_i32 = arith.constant 0 : i32
    %c0_i32_0 = arith.constant 0 : i32
    %c0_i32_1 = arith.constant 0 : i32
    return %c0_i32, %c0_i32_0 : i32, i32
  }
  func.func @transform_5(%arg0: i32) -> (i32, i32) {
    %c0_i32 = arith.constant 0 : i32
    %c0_i32_0 = arith.constant 0 : i32
    %c0_i32_1 = arith.constant 0 : i32
    return %c0_i32, %c0_i32_0 : i32, i32
  }
  func.func @transform_6(%arg0: i32) -> (i32, i32) {
    %c0_i32 = arith.constant 0 : i32
    %c0_i32_0 = arith.constant 0 : i32
    return %arg0, %c0_i32 : i32, i32
  }
}

</mosaic_0001>

<bundles_post_ra>
// kernel: simplified_time_embedding.1
= control target key start
LH: loop header
LB: loop body
LE: loop exit
PB: predicated region body
PF: predicated region fallthrough
CT: control target
= control target key end

     0   :  { %11 = vsyncpa [#allocation3], 0  ;;  %s878_s0 = inlined_call_operand.vmem [shape: f32[16,1], index: 0, kind: input, shape index: {}]   ;;  %s879_s1 = inlined_call_operand.vmem [shape: f32[16,32], index: 1, kind: input, shape index: {}]   ;;  %s880_s2 = inlined_call_operand.vmem [shape: f32[1,128], index: 2, kind: input, shape index: {}]   ;;  %s881_s3 = inlined_call_operand.vmem [shape: f32[1,128], index: 3, kind: input, shape index: {}]   ;;  %s882_s4 = inlined_call_operand.vmem [shape: f32[128,32], index: 4, kind: input, shape index: {}]   ;;  %s883_s5 = inlined_call_operand.vmem [shape: f32[1,32], index: 5, kind: input, shape index: {}]   ;;  %s884_s6 = inlined_call_operand.hbm [shape: f32[16,32], index: 6, kind: output, shape index: {}]  }
   0x1   :  { %13 = vsyncpa [#allocation3 + $0x1], 0  ;;  %s711_s21 = smov 0   ;;  %s713_s22 = smov 0  }
   0x2   :  { %s715_s23 = smov 0   ;;  %s717_s24 = smov 0  }
   0x3 LB: > { %s732_s25 = sadd.s32 4294967295, %s669_s24   ;;  %s473_s26 = sadd.s32 4294967294, %s669_s24   ;;  %s669_s24 = sphi %s717_s24, %s890_s24   ;;  %s665_s23 = sphi %s715_s23, %s889_s23   ;;  %s661_s22 = sphi %s713_s22, %s888_s22   ;;  %s657_s21 = sphi %s711_s21, %s887_s21  }
   0x4   : > { %s736_s27 = sadd.s32 1, %s669_s24   ;;  %s162_s28 = sadd.s32 1, %s665_s23 }
   0x5   : > { %s159_s29 = ssub.s32 %s669_s24, %s736_s27  ;;  %p172_p0 = scmp.ne.s32.totalorder %s665_s23, %s661_s22 }
   0x6   : > { %p160_p1 = scmp.eq.s32.totalorder %s159_s29, 0  ;;  %p173_p2 = scmp.eq.s32.totalorder %s732_s25, 1 }
   0x7   : > { %p178_p3 = scmp.ne.s32.totalorder %s661_s22, %s657_s21  ;;  %p179_p4 = scmp.eq.s32.totalorder %s473_s26, 1 }
   0x8   : > { %s747_s30 = scalar_select %p160_p1, %s665_s23, %s162_s28  }
   0x9   : > { %p749_p5 = por %p173_p2, %p172_p0  ;;  %p753_p6 = por %p179_p4, %p178_p3 }
   0xa   : > { %p476_p7 = scmp.ge.s32.totalorder %s669_s24, 1  ;;  %p223_p8 = scmp.lt.s32.totalorder %s669_s24, 3 }
   0xc   : > { %p224_p9 = pnand %p476_p7, %p223_p8 }
   0xd   : > { %p256_p10 = scmp.lt.s32.totalorder (!%p224_p9), %s732_s25, 1  ;;  %v291_v0 = vld [vmem:[%s882_s4] sm:$0xff] (!%p224_p9)  ;;  %v292_v1 = vld [vmem:[%s882_s4 + $0x8] sm:$0xff] (!%p224_p9)  ;;  %v293_v2 = vld [vmem:[%s882_s4 + $0x10] sm:$0xff] (!%p224_p9)  ;;  %v671_v3 = vmov (!%p224_p9), 0   ;;  %v672_v4 = vmov (!%p224_p9), 0.0|0.0  }
   0xe   : > { %227 = sbr.rel (%p224_p9) target bundleno = 396 (0x18c), region = 44  ;;  %606 = vset.pattern.permute.xlu0 (!%p224_p9), %v671_v3  ;;  %539 = vmatprep.subr.bf16.mxu0 (!%p224_p9), %v672_v4  ;;  %v540_v5 = vpack.c.bf16 (!%p224_p9), %v292_v1, %v291_v0  ;;  %v294_v6 = vld [vmem:[%s882_s4 + $0x18] sm:$0xff] (!%p224_p9)  ;;  %v295_v8 = vld [vmem:[%s882_s4 + $0x20] sm:$0xff] (!%p224_p9)  ;;  %v296_v9 = vld [vmem:[%s882_s4 + $0x28] sm:$0xff] (!%p224_p9)  ;;  %vm673_vm0 = vmmov (!%p224_p9), 0   ;;  %v674_v23 = vmov (!%p224_p9), 0.0  }
   0xf   : > { %v543_v7 = vpack.c.bf16 (!%p224_p9), %v294_v6, %v293_v2  ;;  %v546_v12 = vpack.c.bf16 (!%p224_p9), %v296_v9, %v295_v8  ;;  %v297_v13 = vld [vmem:[%s882_s4 + $0x30] sm:$0xff] (!%p224_p9)  ;;  %v298_v14 = vld [vmem:[%s882_s4 + $0x38] sm:$0xff] (!%p224_p9)  ;;  %v299_v18 = vld [vmem:[%s882_s4 + $0x40] sm:$0xff] (!%p224_p9)  ;;  %536 = vmatprep.mubr.msk.f32.mxu0 (!%p224_p9), %vm673_vm0, %v674_v23  ;;  %s253_s9 = sand.u32 (!%p224_p9), 1, %s661_s22   ;;  %s484_s16 = sshll.u32 (!%p224_p9), %s732_s25, 7  ;;  %vm386_vm1 = vcmask (!%p224_p9), 261120  }
  0x10   : > { %541 = vmatpush3.bf16.msra.mxu0 (!%p224_p9), %v540_v5  ;;  %v549_v17 = vpack.c.bf16 (!%p224_p9), %v298_v14, %v297_v13  ;;  %v300_v19 = vld [vmem:[%s882_s4 + $0x48] sm:$0xff] (!%p224_p9)  ;;  %v301_v21 = vld [vmem:[%s882_s4 + $0x50] sm:$0xff] (!%p224_p9)  ;;  %v302_v22 = vld [vmem:[%s882_s4 + $0x58] sm:$0xff] (!%p224_p9)  ;;  %s836_s28 = scalar_lea.hbm (!%p224_p9), %s884_s6, %s484_s16 }
  0x11   : > { %542 = vmatprep.subr.bf16.mxu0 (!%p224_p9), %v672_v4  ;;  %v552_v20 = vpack.c.bf16 (!%p224_p9), %v300_v19, %v299_v18  ;;  %v555_v24 = vpack.c.bf16 (!%p224_p9), %v302_v22, %v301_v21  ;;  %v303_v25 = vld [vmem:[%s882_s4 + $0x60] sm:$0xff] (!%p224_p9)  ;;  %v304_v26 = vld [vmem:[%s882_s4 + $0x68] sm:$0xff] (!%p224_p9)  ;;  %v305_v28 = vld [vmem:[%s882_s4 + $0x70] sm:$0xff] (!%p224_p9) }
  0x12   : > { %v558_v27 = vpack.c.bf16 (!%p224_p9), %v304_v26, %v303_v25  ;;  %v306_v29 = vld [vmem:[%s882_s4 + $0x78] sm:$0xff] (!%p224_p9)  ;;  %v480_v31 = vld [vmem:[%s880_s2] ss:$0 sm:$0xff] (!%p224_p9) }
  0x13   : > { %v561_v30 = vpack.c.bf16 (!%p224_p9), %v306_v29, %v305_v28  ;;  %v481_v32 = vld [vmem:[%s881_s3] ss:$0 sm:$0xff] (!%p224_p9) }
  0x14   : > { %544 = vmatpush3.bf16.msra.mxu0 (!%p224_p9), %v543_v7  ;;  %v482_v37 = vld [vmem:[%s883_s5] ss:$0 sm:$0xff] (!%p224_p9) }
  0x15   : > { %s773_s17 = scalar_select %p256_p10, %s732_s25, 1  ;;  %545 = vmatprep.subr.bf16.mxu0 %v672_v4 }
  0x16   : > { %s675_s25 = smov [#allocation2]  }
  0x17   : > { %s478_s18 = sshll.u32 %s773_s17, 3 }
  0x18   : > { %s259_s10 = scalar_lea.vmem %s878_s0, %s478_s18  ;;  %547 = vmatpush3.bf16.msra.mxu0 %v546_v12  ;;  %s263_s13 = scalar_lea.vmem %s879_s1, %s478_s18 }
  0x19   : > { %v264_v10 = vld [vmem:[%s259_s10] sm:$0xff]  ;;  %548 = vmatprep.subr.bf16.mxu0 %v672_v4  ;;  %s477_s10 = sshll.u32 %s253_s9, 3  ;;  %s389_s18 = scalar_lea.sflag [#allocation3], %s253_s9 }
  0x1a   : > { %v266_v11 = vmul.f32 3.1709792e-08, %v264_v10  ;;  %v384_v39 = vld [vmem:[%s263_s13] sm:$0xff]  ;;  %s255_s19 = scalar_lea.vmem [#allocation2], %s477_s10  ;;  %s611_s10 = sshll.u32 %s675_s25, 4  ;;  %s612_s10 = int_to_ptr.vmem [resolvable:$false] %s611_s10 }
  0x1b   : > { %s402_s20 = sshll.u32 %s255_s19, 4  ;;  %s613_s11 = scalar_lea.vmem %s612_s10, 256  ;;  %s838_s20 = int_to_ptr.vmem [resolvable:$true] %s402_s20 }
  0x1c   : > { %v267_v15 = vmax.f32 %v266_v11, 0.0  ;;  %550 = vmatpush3.bf16.msra.mxu0 %v549_v17  ;;  %s607_s29 = scalar_lea.vmem %s838_s20, 128  ;;  %p614_p0 = scmp.lt.s32.totalorder %s838_s20, %s612_s10 }
  0x1d   : > { %551 = vmatprep.subr.bf16.mxu0 %v672_v4  ;;  %p608_p11 = scmp.ne.s32.totalorder %s838_s20, %s607_s29  ;;  %p615_p1 = scmp.lt.s32.totalorder %s613_s11, %s607_s29 }
  0x1e   : > { %v268_v16 = vmin.f32 %v267_v15, 1.0 }
  0x1f   : > { %p609_p12 = pnand %p608_p11, %p749_p5  ;;  %p616_p2 = por %p615_p1, %p614_p0 }
  0x20   : > { %272 = vperm.xlu0 %606, %v268_v16   ;;  %553 = vmatpush3.bf16.msra.mxu0 %v552_v20 }
  0x21   : > { %554 = vmatprep.subr.bf16.mxu0 %v672_v4  ;;  %p610_p13 = pneg %p609_p12 }
  0x23   : > { %p617_p3 = pnand %p616_p2, %p610_p13 }
  0x24   : > { %556 = vmatpush3.bf16.msra.mxu0 %v555_v24 }
  0x25   : > { %557 = vmatprep.subr.bf16.mxu0 %v672_v4 }
  0x28   : > { %559 = vmatpush3.bf16.msra.mxu0 %v558_v27 }
  0x29   : > { %560 = vmatprep.subr.bf16.mxu0 %v672_v4 }
  0x2c   : > { %562 = vmatpush3.bf16.msra.mxu0 %v561_v30 }
  0x9f   : > { %v273_v33 = vpop.permute.xlu0 %272 }
  0xa0   : > { %v281_v34 = vmul.f32 %v480_v31, %v273_v33 }
  0xa2   : > { %v289_v35 = vadd.f32 %v481_v32, %v281_v34 }
  0xa4   : > { %v290_v36 = vmax.f32 %v289_v35, 0.0 }
  0xa6   : > { %537 = vmatmul.mubr.f32.vlgmr.msra.gmra.mrb[0].mxu0 %v290_v36 }
 0x179   : > { %v380_v38 = vpop.f32.mrb[0].mxu0 }
 0x17a   : > { %v381_v40 = vadd.f32 %v482_v37, %v380_v38  ;;  %v538_v41 = vpop.f32.mrb[1].mxu0 }
 0x17c   : > { %v385_v42 = vadd.f32 %v384_v39, %v381_v40 }
 0x17e   : > { %387 = vst.msk [vmem:[%s255_s19] sm:$0xff] %vm386_vm1, %v385_v42 }
 0x17f   : > { %620 = shalt.err (!%p617_p3)
}
 0x180   : > { %s621_s9 = scalar_lea.hbm %s836_s28, 128  ;;  %s625_s14 = scalar_lea.hbm %s884_s6, 256 }
 0x181   : > { %p622_p4 = scmp.ne.s32.totalorder %s836_s28, %s621_s9  ;;  %p626_p9 = scmp.lt.u32.totalorder %s836_s28, %s884_s6 }
 0x182   : > { %p627_p10 = scmp.lt.u32.totalorder %s625_s14, %s621_s9  ;;  %p629_p12 = scmp.lt.u32.totalorder %s621_s9, %s836_s28 }
 0x183   : > { %p623_p7 = pnand %p622_p4, %p749_p5 }
 0x184   : > { %p628_p11 = por %p627_p10, %p626_p9 }
 0x185   : > { %p624_p8 = pneg %p623_p7 }
 0x186   : > { %p630_p13 = por %p629_p12, %p628_p11 }
 0x188   : > { %p631_p0 = pnand %p630_p13, %p624_p8 }
 0x18a   : > { %634 = shalt.err (!%p631_p0)
}
 0x18b   : > { %563 = dma.vmem_to_hbm [thread:$0]  (%p749_p5), %s838_s20, 128, %s836_s28, %s389_s18  }
 0x18c PF: > { %p569_p1 = scmp.ge.s32.totalorder %s669_s24, 2  ;;  %s414_s19 = sand.u32 1, %s657_s21  }
 0x18d   : > { %s415_s26 = scalar_lea.sflag [#allocation3], %s414_s19 }
 0x18e   : > { %p566_p2 = pnand %p569_p1, %p753_p6 }
 0x190   : > { %652 = dma.done.wait (!%p566_p2), %s415_s26, 128  }
 0x191   : > { %654 = vsyncadd (!%p566_p2), %s415_s26, 4294967168  ;;  %p16_p3 = scmp.ge.s32.totalorder %s736_s27, 4   ;;  %s887_s21 = smov %s661_s22 }
 0x192   : > { %s888_s22 = smov %s665_s23  ;;  %s889_s23 = smov %s747_s30 }
 0x193   : > { %s890_s24 = smov %s736_s27  ;;  %18 = sbr.rel (!%p16_p3) target bundleno = 3 (0x3), region = 82 }
 0x19a   :  { %420 = vsyncpa [#allocation3], 1 }
 0x19b   :  { %422 = vsyncpa [#allocation3 + $0x1], 1 }

</bundles_post_ra>
